<compile_context>
chip_gen: v7x
topology: tpu7x:2x2x1
jax: 0.10.0
libtpu: 0.0.40
codegen_flags: <defaults>
</compile_context>

<pallas_src>
import math
from functools import partial

import jax
import jax.numpy as jnp
from jax import lax
from jax.experimental import pallas as pl
from jax.experimental.pallas import tpu as pltpu


# ---------------------------------------------------------------------------
# Fused forward kernel
# ---------------------------------------------------------------------------

def _ln_gelu(h, gamma, beta, eps=1e-5):
    mu = jnp.mean(h, axis=-1, keepdims=True)
    var = jnp.mean((h - mu) ** 2, axis=-1, keepdims=True)
    hn = (h - mu) * lax.rsqrt(var + eps)
    hn = hn * gamma + beta
    # exact GELU (torch.nn.GELU default): 0.5*x*(1+erf(x/sqrt(2)))
    return 0.5 * hn * (1.0 + lax.erf(hn * (1.0 / math.sqrt(2.0))))


def fused_classifier_kernel(n_layers,
                            t_ref, uce_ref,
                            tw1_ref, tw2_ref, tb2_ref,
                            l0wu_ref, l0wt_ref, l0g_ref, l0b_ref,
                            lw_ref, lg_ref, lb_ref,
                            ow_ref, ob_ref,
                            o_ref):
    f32 = jnp.float32

    # TimeSiren: sin(t @ w1) @ w2 + b2.  w1 has a single input row, so the
    # (B,1)x(1,T) matmul is a broadcasted multiply (pure VPU work).
    t_e = jnp.sin(t_ref[...] * tw1_ref[...])
    t_e = jnp.dot(t_e, tw2_ref[...], preferred_element_type=f32) + tb2_ref[...]

    # layer0: cat([uce, t_e]) @ W  folded into two dots (split weight rows).
    h0 = jnp.dot(uce_ref[...], l0wu_ref[...], preferred_element_type=f32)
    h0 = h0 + jnp.dot(t_e, l0wt_ref[...], preferred_element_type=f32)
    x = _ln_gelu(h0, l0g_ref[...], l0b_ref[...])

    # residual stack: x = full_block(x) + x   (static unroll, weights in VMEM)
    for i in range(n_layers):
        h = jnp.dot(x, lw_ref[i], preferred_element_type=f32)
        x = _ln_gelu(h, lg_ref[i], lb_ref[i]) + x

    # output head (lane-padded to a multiple of 128; sliced in wrapper)
    o_ref[...] = jnp.dot(x, ow_ref[...], preferred_element_type=f32) + ob_ref[...]


# ---------------------------------------------------------------------------
# Parameter init + forward wrapper
# ---------------------------------------------------------------------------

def _pad128(n):
    return max(128, ((n + 127) // 128) * 128)


def init_params(key, num_class, uce_dim, time_dim, n_layers):
    ks = jax.random.split(key, 5 + n_layers)
    nc_pad = _pad128(num_class)

    def dense(k, din, dout, scale=0.02):
        return scale * jax.random.normal(k, (din, dout), jnp.float32)

    lw = jnp.stack([dense(ks[4 + i], uce_dim, uce_dim) for i in range(n_layers)])
    out_w = dense(ks[4 + n_layers - 1] if n_layers else ks[4], uce_dim, num_class)
    out_w = jnp.pad(out_w, ((0, 0), (0, nc_pad - num_class)))          # lane-dense head

    params = {
        # TimeSiren
        "t_w1": dense(ks[0], 1, time_dim, 1.0),                         # lin1 (no bias)
        "t_w2": dense(ks[1], time_dim, time_dim),                       # lin2 weight
        "t_b2": jnp.zeros((1, time_dim), jnp.float32),                  # lin2 bias
        # layer0 weight split into the uce rows and the time-embedding rows
        "l0_w_uce": dense(ks[2], uce_dim, uce_dim),
        "l0_w_t": dense(ks[3], time_dim, uce_dim),
        "l0_g": jnp.ones((1, uce_dim), jnp.float32),
        "l0_b": jnp.zeros((1, uce_dim), jnp.float32),
        # residual layers (stacked)
        "lw": lw,
        "lg": jnp.ones((n_layers, 1, uce_dim), jnp.float32),
        "lb": jnp.zeros((n_layers, 1, uce_dim), jnp.float32),
        # output head (padded to nc_pad lanes)
        "out_w": out_w,
        "out_b": jnp.zeros((1, nc_pad), jnp.float32),
    }
    return params


def _resident(shape):
    """Full-extent BlockSpec: block == whole array, same block at every grid step."""
    zeros = (0,) * len(shape)
    return pl.BlockSpec(tuple(shape), lambda i, z=zeros: z)


def classifier_mlp_forward(params, uce, t, *, num_class, uce_dim, time_dim,
                           n_layers, tile_b_max=512):
    f32 = jnp.float32
    B = uce.shape[0]
    uce = uce.astype(f32)
    t = t.astype(f32).reshape(B, 1)
    nc_pad = params["out_w"].shape[1]

    # --- batch padding / tiling (degenerates to a single block for tiny B) ----
    B_pad = max(8, ((B + 7) // 8) * 8)
    if B_pad > tile_b_max:
        tile_b = tile_b_max
        B_pad = ((B + tile_b - 1) // tile_b) * tile_b
    else:
        tile_b = B_pad
    if B_pad != B:
        uce = jnp.pad(uce, ((0, B_pad - B), (0, 0)))
        t = jnp.pad(t, ((0, B_pad - B), (0, 0)))
    grid = (B_pad // tile_b,)

    in_specs = [
        pl.BlockSpec((tile_b, 1), lambda i: (i, 0)),          # t
        pl.BlockSpec((tile_b, uce_dim), lambda i: (i, 0)),    # uce
        _resident(params["t_w1"].shape),
        _resident(params["t_w2"].shape),
        _resident(params["t_b2"].shape),
        _resident(params["l0_w_uce"].shape),
        _resident(params["l0_w_t"].shape),
        _resident(params["l0_g"].shape),
        _resident(params["l0_b"].shape),
        _resident(params["lw"].shape),
        _resident(params["lg"].shape),
        _resident(params["lb"].shape),
        _resident(params["out_w"].shape),
        _resident(params["out_b"].shape),
    ]
    out_specs = pl.BlockSpec((tile_b, nc_pad), lambda i: (i, 0))

    # VMEM budget: weights (conservatively x2 for buffering) + activation tiles.
    weight_bytes = sum(int(v.size) * 4 for v in params.values())
    act_bytes = tile_b * (2 * uce_dim + time_dim + nc_pad) * 4
    vmem_limit = int(min(2.2 * weight_bytes + 6 * act_bytes + (4 << 20), 120 << 20))

    out = pl.pallas_call(
        partial(fused_classifier_kernel, n_layers),
        out_shape=jax.ShapeDtypeStruct((B_pad, nc_pad), f32),
        grid=grid,
        in_specs=in_specs,
        out_specs=out_specs,
        compiler_params=pltpu.CompilerParams(
            dimension_semantics=("parallel",),   # shards batch tiles on v7x's 2 TCs
            vmem_limit_bytes=vmem_limit,
        ),
    )(t, uce,
      params["t_w1"], params["t_w2"], params["t_b2"],
      params["l0_w_uce"], params["l0_w_t"], params["l0_g"], params["l0_b"],
      params["lw"], params["lg"], params["lb"],
      params["out_w"], params["out_b"])

    return out[:B, :num_class]


# ---------------------------------------------------------------------------
# Pure-JAX reference (sanity check)
# ---------------------------------------------------------------------------

def reference_forward(params, uce, t, num_class, n_layers):
    def gelu(v):
        return 0.5 * v * (1.0 + lax.erf(v / math.sqrt(2.0)))

    def block(v, w, g, b):
        h = v @ w
        mu = h.mean(-1, keepdims=True)
        var = ((h - mu) ** 2).mean(-1, keepdims=True)
        hn = (h - mu) / jnp.sqrt(var + 1e-5) * g + b
        return gelu(hn)

    tf = t.astype(jnp.float32).reshape(-1, 1)
    t_e = jnp.sin(tf @ params["t_w1"]) @ params["t_w2"] + params["t_b2"]
    x = jnp.concatenate([uce.astype(jnp.float32), t_e], axis=-1)
    l0_w = jnp.concatenate([params["l0_w_uce"], params["l0_w_t"]], axis=0)
    x = block(x, l0_w, params["l0_g"], params["l0_b"])
    for i in range(n_layers):
        x = block(x, params["lw"][i], params["lg"][i], params["lb"][i]) + x
    logits = x @ params["out_w"] + params["out_b"]
    return logits[:, :num_class]


# ---------------------------------------------------------------------------

if __name__ == "__main__":
    NUM_CLASS, UCE_DIM, TIME_DIM, N_LAYERS, BATCH = 8, 128, 32, 2, 8

    key = jax.random.PRNGKey(0)
    k_p, k_u, k_t = jax.random.split(key, 3)
    params = init_params(k_p, NUM_CLASS, UCE_DIM, TIME_DIM, N_LAYERS)

    uce = jax.random.normal(k_u, (BATCH, UCE_DIM), jnp.float32)
    t = jax.random.uniform(k_t, (BATCH, 1), jnp.float32)

    fwd = jax.jit(
        partial(classifier_mlp_forward, num_class=NUM_CLASS, uce_dim=UCE_DIM,
                time_dim=TIME_DIM, n_layers=N_LAYERS)
    )
    logits = fwd(params, uce, t)
    jax.block_until_ready(logits)

    ref = reference_forward(params, uce, t, NUM_CLASS, N_LAYERS)
    assert logits.shape == (BATCH, NUM_CLASS)
    assert jnp.allclose(logits, ref, rtol=1e-4, atol=1e-4), "mismatch vs reference"

    print("KERNEL_OK")
</pallas_src>

<mosaic_0001>
module attributes {stable_mosaic.version = 11 : i64} {
  func.func @fused_classifier_kernel(%arg0: i32, %arg1: memref<8x1xf32, #tpu.memory_space<vmem>>, %arg2: memref<8x128xf32, #tpu.memory_space<vmem>>, %arg3: memref<1x32xf32, #tpu.memory_space<vmem>>, %arg4: memref<32x32xf32, #tpu.memory_space<vmem>>, %arg5: memref<1x32xf32, #tpu.memory_space<vmem>>, %arg6: memref<128x128xf32, #tpu.memory_space<vmem>>, %arg7: memref<32x128xf32, #tpu.memory_space<vmem>>, %arg8: memref<1x128xf32, #tpu.memory_space<vmem>>, %arg9: memref<1x128xf32, #tpu.memory_space<vmem>>, %arg10: memref<2x128x128xf32, #tpu.memory_space<vmem>>, %arg11: memref<2x1x128xf32, #tpu.memory_space<vmem>>, %arg12: memref<2x1x128xf32, #tpu.memory_space<vmem>>, %arg13: memref<128x128xf32, #tpu.memory_space<vmem>>, %arg14: memref<1x128xf32, #tpu.memory_space<vmem>>, %arg15: memref<8x128xf32, #tpu.memory_space<vmem>>) attributes {dimension_semantics = [#tpu.dimension_semantics<parallel>], iteration_bounds = array<i64: 1>, scalar_prefetch = 0 : i64, scratch_operands = 0 : i64, tpu.core_type = #tpu.core_type<tc>, window_params = [{transform_indices = @transform_0, window_bounds = array<i64: 8, 1>}, {transform_indices = @transform_1, window_bounds = array<i64: 8, 128>}, {pipeline_mode = #tpu.pipeline_mode<synchronous>, transform_indices = @transform_2, window_bounds = array<i64: 1, 32>}, {pipeline_mode = #tpu.pipeline_mode<synchronous>, transform_indices = @transform_3, window_bounds = array<i64: 32, 32>}, {pipeline_mode = #tpu.pipeline_mode<synchronous>, transform_indices = @transform_4, window_bounds = array<i64: 1, 32>}, {pipeline_mode = #tpu.pipeline_mode<synchronous>, transform_indices = @transform_5, window_bounds = array<i64: 128, 128>}, {pipeline_mode = #tpu.pipeline_mode<synchronous>, transform_indices = @transform_6, window_bounds = array<i64: 32, 128>}, {pipeline_mode = #tpu.pipeline_mode<synchronous>, transform_indices = @transform_7, window_bounds = array<i64: 1, 128>}, {pipeline_mode = #tpu.pipeline_mode<synchronous>, transform_indices = @transform_8, window_bounds = array<i64: 1, 128>}, {pipeline_mode = #tpu.pipeline_mode<synchronous>, transform_indices = @transform_9, window_bounds = array<i64: 2, 128, 128>}, {pipeline_mode = #tpu.pipeline_mode<synchronous>, transform_indices = @transform_10, window_bounds = array<i64: 2, 1, 128>}, {pipeline_mode = #tpu.pipeline_mode<synchronous>, transform_indices = @transform_11, window_bounds = array<i64: 2, 1, 128>}, {pipeline_mode = #tpu.pipeline_mode<synchronous>, transform_indices = @transform_12, window_bounds = array<i64: 128, 128>}, {pipeline_mode = #tpu.pipeline_mode<synchronous>, transform_indices = @transform_13, window_bounds = array<i64: 1, 128>}, {transform_indices = @transform_14, window_bounds = array<i64: 8, 128>}]} {
    %c0 = arith.constant 0 : index
    %c0_0 = arith.constant 0 : index
    %0 = vector.load %arg1[%c0, %c0_0] : memref<8x1xf32, #tpu.memory_space<vmem>>, vector<8x1xf32>
    %c0_1 = arith.constant 0 : index
    %c0_2 = arith.constant 0 : index
    %1 = vector.load %arg3[%c0_1, %c0_2] : memref<1x32xf32, #tpu.memory_space<vmem>>, vector<1x32xf32>
    %2 = vector.broadcast %0 : vector<8x1xf32> to vector<8x32xf32>
    %3 = vector.broadcast %1 : vector<1x32xf32> to vector<8x32xf32>
    %4 = arith.mulf %2, %3 : vector<8x32xf32>
    %5 = math.sin %4 : vector<8x32xf32>
    %c0_3 = arith.constant 0 : index
    %c0_4 = arith.constant 0 : index
    %6 = vector.load %arg4[%c0_3, %c0_4] : memref<32x32xf32, #tpu.memory_space<vmem>>, vector<32x32xf32>
    %cst = arith.constant dense<0.000000e+00> : vector<8x32xf32>
    %7 = tpu.matmul %5, %6, %cst {dimension_numbers = #tpu.dot_dimension_numbers<[1], [0], [0], [1], [0, 0, 1, 1], [], []>} : vector<8x32xf32>, vector<32x32xf32>, vector<8x32xf32> -> vector<8x32xf32>
    %c0_5 = arith.constant 0 : index
    %c0_6 = arith.constant 0 : index
    %8 = vector.load %arg5[%c0_5, %c0_6] : memref<1x32xf32, #tpu.memory_space<vmem>>, vector<1x32xf32>
    %9 = vector.broadcast %8 : vector<1x32xf32> to vector<8x32xf32>
    %10 = arith.addf %7, %9 : vector<8x32xf32>
    %c0_7 = arith.constant 0 : index
    %c0_8 = arith.constant 0 : index
    %11 = vector.load %arg2[%c0_7, %c0_8] : memref<8x128xf32, #tpu.memory_space<vmem>>, vector<8x128xf32>
    %c0_9 = arith.constant 0 : index
    %c0_10 = arith.constant 0 : index
    %12 = vector.load %arg6[%c0_9, %c0_10] : memref<128x128xf32, #tpu.memory_space<vmem>>, vector<128x128xf32>
    %cst_11 = arith.constant dense<0.000000e+00> : vector<8x128xf32>
    %13 = tpu.matmul %11, %12, %cst_11 {dimension_numbers = #tpu.dot_dimension_numbers<[1], [0], [0], [1], [0, 0, 1, 1], [], []>} : vector<8x128xf32>, vector<128x128xf32>, vector<8x128xf32> -> vector<8x128xf32>
    %c0_12 = arith.constant 0 : index
    %c0_13 = arith.constant 0 : index
    %14 = vector.load %arg7[%c0_12, %c0_13] : memref<32x128xf32, #tpu.memory_space<vmem>>, vector<32x128xf32>
    %cst_14 = arith.constant dense<0.000000e+00> : vector<8x128xf32>
    %15 = tpu.matmul %10, %14, %cst_14 {dimension_numbers = #tpu.dot_dimension_numbers<[1], [0], [0], [1], [0, 0, 1, 1], [], []>} : vector<8x32xf32>, vector<32x128xf32>, vector<8x128xf32> -> vector<8x128xf32>
    %16 = arith.addf %13, %15 : vector<8x128xf32>
    %c0_15 = arith.constant 0 : index
    %c0_16 = arith.constant 0 : index
    %17 = vector.load %arg8[%c0_15, %c0_16] : memref<1x128xf32, #tpu.memory_space<vmem>>, vector<1x128xf32>
    %c0_17 = arith.constant 0 : index
    %c0_18 = arith.constant 0 : index
    %18 = vector.load %arg9[%c0_17, %c0_18] : memref<1x128xf32, #tpu.memory_space<vmem>>, vector<1x128xf32>
    %cst_19 = arith.constant dense<0.000000e+00> : vector<8xf32>
    %19 = vector.multi_reduction <add>, %16, %cst_19 [1] : vector<8x128xf32> to vector<8xf32>
    %20 = vector.shape_cast %19 : vector<8xf32> to vector<8x1xf32>
    %cst_20 = arith.constant 1.280000e+02 : f32
    %21 = vector.broadcast %cst_20 : f32 to vector<8x1xf32>
    %22 = arith.divf %20, %21 : vector<8x1xf32>
    %23 = vector.broadcast %22 : vector<8x1xf32> to vector<8x128xf32>
    %24 = arith.subf %16, %23 : vector<8x128xf32>
    %25 = arith.mulf %24, %24 : vector<8x128xf32>
    %cst_21 = arith.constant dense<0.000000e+00> : vector<8xf32>
    %26 = vector.multi_reduction <add>, %25, %cst_21 [1] : vector<8x128xf32> to vector<8xf32>
    %27 = vector.shape_cast %26 : vector<8xf32> to vector<8x1xf32>
    %cst_22 = arith.constant 1.280000e+02 : f32
    %28 = vector.broadcast %cst_22 : f32 to vector<8x1xf32>
    %29 = arith.divf %27, %28 : vector<8x1xf32>
    %30 = vector.broadcast %22 : vector<8x1xf32> to vector<8x128xf32>
    %31 = arith.subf %16, %30 : vector<8x128xf32>
    %cst_23 = arith.constant 9.99999974E-6 : f32
    %32 = vector.broadcast %cst_23 : f32 to vector<8x1xf32>
    %33 = arith.addf %29, %32 : vector<8x1xf32>
    %34 = math.rsqrt %33 : vector<8x1xf32>
    %35 = vector.broadcast %34 : vector<8x1xf32> to vector<8x128xf32>
    %36 = arith.mulf %31, %35 : vector<8x128xf32>
    %37 = vector.broadcast %17 : vector<1x128xf32> to vector<8x128xf32>
    %38 = arith.mulf %36, %37 : vector<8x128xf32>
    %39 = vector.broadcast %18 : vector<1x128xf32> to vector<8x128xf32>
    %40 = arith.addf %38, %39 : vector<8x128xf32>
    %cst_24 = arith.constant 5.000000e-01 : f32
    %41 = vector.broadcast %cst_24 : f32 to vector<8x128xf32>
    %42 = arith.mulf %41, %40 : vector<8x128xf32>
    %cst_25 = arith.constant 0.707106769 : f32
    %43 = vector.broadcast %cst_25 : f32 to vector<8x128xf32>
    %44 = arith.mulf %40, %43 : vector<8x128xf32>
    %45 = math.erf %44 : vector<8x128xf32>
    %cst_26 = arith.constant 1.000000e+00 : f32
    %46 = vector.broadcast %cst_26 : f32 to vector<8x128xf32>
    %47 = arith.addf %46, %45 : vector<8x128xf32>
    %48 = arith.mulf %42, %47 : vector<8x128xf32>
    %c0_27 = arith.constant 0 : index
    %c0_28 = arith.constant 0 : index
    %c0_29 = arith.constant 0 : index
    %49 = vector.load %arg10[%c0_27, %c0_28, %c0_29] : memref<2x128x128xf32, #tpu.memory_space<vmem>>, vector<1x128x128xf32>
    %50 = vector.shape_cast %49 : vector<1x128x128xf32> to vector<128x128xf32>
    %cst_30 = arith.constant dense<0.000000e+00> : vector<8x128xf32>
    %51 = tpu.matmul %48, %50, %cst_30 {dimension_numbers = #tpu.dot_dimension_numbers<[1], [0], [0], [1], [0, 0, 1, 1], [], []>} : vector<8x128xf32>, vector<128x128xf32>, vector<8x128xf32> -> vector<8x128xf32>
    %c0_31 = arith.constant 0 : index
    %c0_32 = arith.constant 0 : index
    %c0_33 = arith.constant 0 : index
    %52 = vector.load %arg11[%c0_31, %c0_32, %c0_33] : memref<2x1x128xf32, #tpu.memory_space<vmem>>, vector<1x1x128xf32>
    %53 = vector.shape_cast %52 : vector<1x1x128xf32> to vector<1x128xf32>
    %c0_34 = arith.constant 0 : index
    %c0_35 = arith.constant 0 : index
    %c0_36 = arith.constant 0 : index
    %54 = vector.load %arg12[%c0_34, %c0_35, %c0_36] : memref<2x1x128xf32, #tpu.memory_space<vmem>>, vector<1x1x128xf32>
    %55 = vector.shape_cast %54 : vector<1x1x128xf32> to vector<1x128xf32>
    %cst_37 = arith.constant dense<0.000000e+00> : vector<8xf32>
    %56 = vector.multi_reduction <add>, %51, %cst_37 [1] : vector<8x128xf32> to vector<8xf32>
    %57 = vector.shape_cast %56 : vector<8xf32> to vector<8x1xf32>
    %cst_38 = arith.constant 1.280000e+02 : f32
    %58 = vector.broadcast %cst_38 : f32 to vector<8x1xf32>
    %59 = arith.divf %57, %58 : vector<8x1xf32>
    %60 = vector.broadcast %59 : vector<8x1xf32> to vector<8x128xf32>
    %61 = arith.subf %51, %60 : vector<8x128xf32>
    %62 = arith.mulf %61, %61 : vector<8x128xf32>
    %cst_39 = arith.constant dense<0.000000e+00> : vector<8xf32>
    %63 = vector.multi_reduction <add>, %62, %cst_39 [1] : vector<8x128xf32> to vector<8xf32>
    %64 = vector.shape_cast %63 : vector<8xf32> to vector<8x1xf32>
    %cst_40 = arith.constant 1.280000e+02 : f32
    %65 = vector.broadcast %cst_40 : f32 to vector<8x1xf32>
    %66 = arith.divf %64, %65 : vector<8x1xf32>
    %67 = vector.broadcast %59 : vector<8x1xf32> to vector<8x128xf32>
    %68 = arith.subf %51, %67 : vector<8x128xf32>
    %cst_41 = arith.constant 9.99999974E-6 : f32
    %69 = vector.broadcast %cst_41 : f32 to vector<8x1xf32>
    %70 = arith.addf %66, %69 : vector<8x1xf32>
    %71 = math.rsqrt %70 : vector<8x1xf32>
    %72 = vector.broadcast %71 : vector<8x1xf32> to vector<8x128xf32>
    %73 = arith.mulf %68, %72 : vector<8x128xf32>
    %74 = vector.broadcast %53 : vector<1x128xf32> to vector<8x128xf32>
    %75 = arith.mulf %73, %74 : vector<8x128xf32>
    %76 = vector.broadcast %55 : vector<1x128xf32> to vector<8x128xf32>
    %77 = arith.addf %75, %76 : vector<8x128xf32>
    %cst_42 = arith.constant 5.000000e-01 : f32
    %78 = vector.broadcast %cst_42 : f32 to vector<8x128xf32>
    %79 = arith.mulf %78, %77 : vector<8x128xf32>
    %cst_43 = arith.constant 0.707106769 : f32
    %80 = vector.broadcast %cst_43 : f32 to vector<8x128xf32>
    %81 = arith.mulf %77, %80 : vector<8x128xf32>
    %82 = math.erf %81 : vector<8x128xf32>
    %cst_44 = arith.constant 1.000000e+00 : f32
    %83 = vector.broadcast %cst_44 : f32 to vector<8x128xf32>
    %84 = arith.addf %83, %82 : vector<8x128xf32>
    %85 = arith.mulf %79, %84 : vector<8x128xf32>
    %86 = arith.addf %85, %48 : vector<8x128xf32>
    %c1 = arith.constant 1 : index
    %c0_45 = arith.constant 0 : index
    %c0_46 = arith.constant 0 : index
    %87 = vector.load %arg10[%c1, %c0_45, %c0_46] : memref<2x128x128xf32, #tpu.memory_space<vmem>>, vector<1x128x128xf32>
    %88 = vector.shape_cast %87 : vector<1x128x128xf32> to vector<128x128xf32>
    %cst_47 = arith.constant dense<0.000000e+00> : vector<8x128xf32>
    %89 = tpu.matmul %86, %88, %cst_47 {dimension_numbers = #tpu.dot_dimension_numbers<[1], [0], [0], [1], [0, 0, 1, 1], [], []>} : vector<8x128xf32>, vector<128x128xf32>, vector<8x128xf32> -> vector<8x128xf32>
    %c1_48 = arith.constant 1 : index
    %c0_49 = arith.constant 0 : index
    %c0_50 = arith.constant 0 : index
    %90 = vector.load %arg11[%c1_48, %c0_49, %c0_50] : memref<2x1x128xf32, #tpu.memory_space<vmem>>, vector<1x1x128xf32>
    %91 = vector.shape_cast %90 : vector<1x1x128xf32> to vector<1x128xf32>
    %c1_51 = arith.constant 1 : index
    %c0_52 = arith.constant 0 : index
    %c0_53 = arith.constant 0 : index
    %92 = vector.load %arg12[%c1_51, %c0_52, %c0_53] : memref<2x1x128xf32, #tpu.memory_space<vmem>>, vector<1x1x128xf32>
    %93 = vector.shape_cast %92 : vector<1x1x128xf32> to vector<1x128xf32>
    %cst_54 = arith.constant dense<0.000000e+00> : vector<8xf32>
    %94 = vector.multi_reduction <add>, %89, %cst_54 [1] : vector<8x128xf32> to vector<8xf32>
    %95 = vector.shape_cast %94 : vector<8xf32> to vector<8x1xf32>
    %cst_55 = arith.constant 1.280000e+02 : f32
    %96 = vector.broadcast %cst_55 : f32 to vector<8x1xf32>
    %97 = arith.divf %95, %96 : vector<8x1xf32>
    %98 = vector.broadcast %97 : vector<8x1xf32> to vector<8x128xf32>
    %99 = arith.subf %89, %98 : vector<8x128xf32>
    %100 = arith.mulf %99, %99 : vector<8x128xf32>
    %cst_56 = arith.constant dense<0.000000e+00> : vector<8xf32>
    %101 = vector.multi_reduction <add>, %100, %cst_56 [1] : vector<8x128xf32> to vector<8xf32>
    %102 = vector.shape_cast %101 : vector<8xf32> to vector<8x1xf32>
    %cst_57 = arith.constant 1.280000e+02 : f32
    %103 = vector.broadcast %cst_57 : f32 to vector<8x1xf32>
    %104 = arith.divf %102, %103 : vector<8x1xf32>
    %105 = vector.broadcast %97 : vector<8x1xf32> to vector<8x128xf32>
    %106 = arith.subf %89, %105 : vector<8x128xf32>
    %cst_58 = arith.constant 9.99999974E-6 : f32
    %107 = vector.broadcast %cst_58 : f32 to vector<8x1xf32>
    %108 = arith.addf %104, %107 : vector<8x1xf32>
    %109 = math.rsqrt %108 : vector<8x1xf32>
    %110 = vector.broadcast %109 : vector<8x1xf32> to vector<8x128xf32>
    %111 = arith.mulf %106, %110 : vector<8x128xf32>
    %112 = vector.broadcast %91 : vector<1x128xf32> to vector<8x128xf32>
    %113 = arith.mulf %111, %112 : vector<8x128xf32>
    %114 = vector.broadcast %93 : vector<1x128xf32> to vector<8x128xf32>
    %115 = arith.addf %113, %114 : vector<8x128xf32>
    %cst_59 = arith.constant 5.000000e-01 : f32
    %116 = vector.broadcast %cst_59 : f32 to vector<8x128xf32>
    %117 = arith.mulf %116, %115 : vector<8x128xf32>
    %cst_60 = arith.constant 0.707106769 : f32
    %118 = vector.broadcast %cst_60 : f32 to vector<8x128xf32>
    %119 = arith.mulf %115, %118 : vector<8x128xf32>
    %120 = math.erf %119 : vector<8x128xf32>
    %cst_61 = arith.constant 1.000000e+00 : f32
    %121 = vector.broadcast %cst_61 : f32 to vector<8x128xf32>
    %122 = arith.addf %121, %120 : vector<8x128xf32>
    %123 = arith.mulf %117, %122 : vector<8x128xf32>
    %124 = arith.addf %123, %86 : vector<8x128xf32>
    %c0_62 = arith.constant 0 : index
    %c0_63 = arith.constant 0 : index
    %125 = vector.load %arg13[%c0_62, %c0_63] : memref<128x128xf32, #tpu.memory_space<vmem>>, vector<128x128xf32>
    %cst_64 = arith.constant dense<0.000000e+00> : vector<8x128xf32>
    %126 = tpu.matmul %124, %125, %cst_64 {dimension_numbers = #tpu.dot_dimension_numbers<[1], [0], [0], [1], [0, 0, 1, 1], [], []>} : vector<8x128xf32>, vector<128x128xf32>, vector<8x128xf32> -> vector<8x128xf32>
    %c0_65 = arith.constant 0 : index
    %c0_66 = arith.constant 0 : index
    %127 = vector.load %arg14[%c0_65, %c0_66] : memref<1x128xf32, #tpu.memory_space<vmem>>, vector<1x128xf32>
    %128 = vector.broadcast %127 : vector<1x128xf32> to vector<8x128xf32>
    %129 = arith.addf %126, %128 : vector<8x128xf32>
    %c0_67 = arith.constant 0 : index
    %c0_68 = arith.constant 0 : index
    %130 = vector.load %arg15[%c0_67, %c0_68] : memref<8x128xf32, #tpu.memory_space<vmem>>, vector<8x128xf32>
    tpu.vector_store %arg15[%c0_67, %c0_68], %129 {strides = array<i32>} : memref<8x128xf32, #tpu.memory_space<vmem>>, vector<8x128xf32>,
    return
  }
  func.func @transform_0(%arg0: i32) -> (i32, i32) {
    %c0_i32 = arith.constant 0 : i32
    %c0_i32_0 = arith.constant 0 : i32
    return %arg0, %c0_i32 : i32, i32
  }
  func.func @transform_1(%arg0: i32) -> (i32, i32) {
    %c0_i32 = arith.constant 0 : i32
    %c0_i32_0 = arith.constant 0 : i32
    return %arg0, %c0_i32 : i32, i32
  }
  func.func @transform_2(%arg0: i32) -> (i32, i32) {
    %c0_i32 = arith.constant 0 : i32
    %c0_i32_0 = arith.constant 0 : i32
    %c0_i32_1 = arith.constant 0 : i32
    return %c0_i32, %c0_i32_0 : i32, i32
  }
  func.func @transform_3(%arg0: i32) -> (i32, i32) {
    %c0_i32 = arith.constant 0 : i32
    %c0_i32_0 = arith.constant 0 : i32
    %c0_i32_1 = arith.constant 0 : i32
    return %c0_i32, %c0_i32_0 : i32, i32
  }
  func.func @transform_4(%arg0: i32) -> (i32, i32) {
    %c0_i32 = arith.constant 0 : i32
    %c0_i32_0 = arith.constant 0 : i32
    %c0_i32_1 = arith.constant 0 : i32
    return %c0_i32, %c0_i32_0 : i32, i32
  }
  func.func @transform_5(%arg0: i32) -> (i32, i32) {
    %c0_i32 = arith.constant 0 : i32
    %c0_i32_0 = arith.constant 0 : i32
    %c0_i32_1 = arith.constant 0 : i32
    return %c0_i32, %c0_i32_0 : i32, i32
  }
  func.func @transform_6(%arg0: i32) -> (i32, i32) {
    %c0_i32 = arith.constant 0 : i32
    %c0_i32_0 = arith.constant 0 : i32
    %c0_i32_1 = arith.constant 0 : i32
    return %c0_i32, %c0_i32_0 : i32, i32
  }
  func.func @transform_7(%arg0: i32) -> (i32, i32) {
    %c0_i32 = arith.constant 0 : i32
    %c0_i32_0 = arith.constant 0 : i32
    %c0_i32_1 = arith.constant 0 : i32
    return %c0_i32, %c0_i32_0 : i32, i32
  }
  func.func @transform_8(%arg0: i32) -> (i32, i32) {
    %c0_i32 = arith.constant 0 : i32
    %c0_i32_0 = arith.constant 0 : i32
    %c0_i32_1 = arith.constant 0 : i32
    return %c0_i32, %c0_i32_0 : i32, i32
  }
  func.func @transform_9(%arg0: i32) -> (i32, i32, i32) {
    %c0_i32 = arith.constant 0 : i32
    %c0_i32_0 = arith.constant 0 : i32
    %c0_i32_1 = arith.constant 0 : i32
    %c0_i32_2 = arith.constant 0 : i32
    return %c0_i32, %c0_i32_0, %c0_i32_1 : i32, i32, i32
  }
  func.func @transform_10(%arg0: i32) -> (i32, i32, i32) {
    %c0_i32 = arith.constant 0 : i32
    %c0_i32_0 = arith.constant 0 : i32
    %c0_i32_1 = arith.constant 0 : i32
    %c0_i32_2 = arith.constant 0 : i32
    return %c0_i32, %c0_i32_0, %c0_i32_1 : i32, i32, i32
  }
  func.func @transform_11(%arg0: i32) -> (i32, i32, i32) {
    %c0_i32 = arith.constant 0 : i32
    %c0_i32_0 = arith.constant 0 : i32
    %c0_i32_1 = arith.constant 0 : i32
    %c0_i32_2 = arith.constant 0 : i32
    return %c0_i32, %c0_i32_0, %c0_i32_1 : i32, i32, i32
  }
  func.func @transform_12(%arg0: i32) -> (i32, i32) {
    %c0_i32 = arith.constant 0 : i32
    %c0_i32_0 = arith.constant 0 : i32
    %c0_i32_1 = arith.constant 0 : i32
    return %c0_i32, %c0_i32_0 : i32, i32
  }
  func.func @transform_13(%arg0: i32) -> (i32, i32) {
    %c0_i32 = arith.constant 0 : i32
    %c0_i32_0 = arith.constant 0 : i32
    %c0_i32_1 = arith.constant 0 : i32
    return %c0_i32, %c0_i32_0 : i32, i32
  }
  func.func @transform_14(%arg0: i32) -> (i32, i32) {
    %c0_i32 = arith.constant 0 : i32
    %c0_i32_0 = arith.constant 0 : i32
    return %arg0, %c0_i32 : i32, i32
  }
}

</mosaic_0001>

<bundles_post_ra>
// kernel: classifier_mlp_forward.1
= control target key start
LH: loop header
LB: loop body
LE: loop exit
PB: predicated region body
PF: predicated region fallthrough
CT: control target
= control target key end

     0   :  { %19 = vsyncpa [#allocation3], 0  ;;  %s1678_s0 = inlined_call_operand.vmem [shape: f32[8,1], index: 0, kind: input, shape index: {}]   ;;  %s1679_s1 = inlined_call_operand.vmem [shape: f32[8,128], index: 1, kind: input, shape index: {}]   ;;  %s1680_s2 = inlined_call_operand.vmem [shape: f32[1,32], index: 2, kind: input, shape index: {}]   ;;  %s1681_s3 = inlined_call_operand.vmem [shape: f32[32,32], index: 3, kind: input, shape index: {}]   ;;  %s1682_s4 = inlined_call_operand.vmem [shape: f32[1,32], index: 4, kind: input, shape index: {}]   ;;  %s1683_s5 = inlined_call_operand.hbm [shape: f32[128,128], index: 5, kind: input, shape index: {}]   ;;  %s1684_s6 = inlined_call_operand.hbm [shape: f32[32,128], index: 6, kind: input, shape index: {}]   ;;  %s1685_s7 = inlined_call_operand.vmem [shape: f32[1,128], index: 7, kind: input, shape index: {}]   ;;  %s1686_s8 = inlined_call_operand.vmem [shape: f32[1,128], index: 8, kind: input, shape index: {}]   ;;  %s1687_s9 = inlined_call_operand.hbm [shape: f32[2,128,128], index: 9, kind: input, shape index: {}]   ;;  %s1688_s10 = inlined_call_operand.vmem [shape: f32[2,1,128], index: 10, kind: input, shape index: {}]   ;;  %s1689_s11 = inlined_call_operand.vmem [shape: f32[2,1,128], index: 11, kind: input, shape index: {}]   ;;  %s1690_s12 = inlined_call_operand.hbm [shape: f32[128,128], index: 12, kind: input, shape index: {}]   ;;  %s1691_s13 = inlined_call_operand.vmem [shape: f32[1,128], index: 13, kind: input, shape index: {}]   ;;  %s1692_s14 = inlined_call_operand.hbm [shape: f32[8,128], index: 14, kind: output, shape index: {}]  }
   0x1   :  { %20 = vsyncpa [#allocation6], 0 }
   0x2   :  { %21 = vsyncpa [#allocation9], 0 }
   0x3   :  { %22 = vsyncpa [#allocation4], 0  ;;  %s1378_s29 = smov [#allocation5]   ;;  %s1379_s15 = smov [#allocation2]  }
   0x4   :  { %s50_s30 = sshll.u32 %s1378_s29, 4  ;;  %s38_s16 = sshll.u32 %s1379_s15, 4  ;;  %s51_s30 = int_to_ptr.vmem [resolvable:$true] %s50_s30  ;;  %s1470_s16 = int_to_ptr.vmem [resolvable:$true] %s38_s16 }
   0x5   :  { %s1260_s19 = scalar_lea.hbm %s1684_s6, 512 }
   0x6   :  { %p1261_p0 = scmp.ne.s32.totalorder %s1684_s6, %s1260_s19  ;;  %p1264_p1 = scmp.lt.u32.totalorder %s1260_s19, %s1684_s6 }
   0x8   :  { %p1266_p2 = pnand %p1264_p1, %p1261_p0 }
   0xa   :  { %1269 = shalt.err (!%p1266_p2)
}
   0xb   :  { %s1270_s24 = scalar_lea.vmem %s51_s30, 512  ;;  %p1275_p4 = scmp.lt.s32.totalorder %s51_s30, %s51_s30 }
   0xc   :  { %p1271_p3 = scmp.ne.s32.totalorder %s51_s30, %s1270_s24  ;;  %p1276_p5 = scmp.lt.s32.totalorder %s1270_s24, %s1270_s24 }
   0xe   :  { %p1277_p6 = por %p1276_p5, %p1275_p4 }
  0x10   :  { %p1278_p7 = pnand %p1277_p6, %p1271_p3 }
  0x12   :  { %1281 = shalt.err (!%p1278_p7)
}
  0x13   :  { %s1380_s25 = smov 128   ;;  %s1381_s26 = smov 8  }
  0x14   :  { %56 = dma.hbm_to_vmem [thread:$0]  %s1684_s6, 512, %s51_s30, [#allocation6], %s1380_s25, %s1380_s25, %s1381_s26  }
  0x15   :  { %s1282_s17 = scalar_lea.hbm %s1683_s5, 2048 }
  0x16   :  { %p1283_p8 = scmp.ne.s32.totalorder %s1683_s5, %s1282_s17  ;;  %p1286_p9 = scmp.lt.u32.totalorder %s1282_s17, %s1683_s5 }
  0x18   :  { %p1288_p10 = pnand %p1286_p9, %p1283_p8 }
  0x1a   :  { %1291 = shalt.err (!%p1288_p10)
}
  0x1b   :  { %s1292_s22 = scalar_lea.vmem %s1470_s16, 2048  ;;  %p1297_p12 = scmp.lt.s32.totalorder %s1470_s16, %s1470_s16 }
  0x1c   :  { %p1293_p11 = scmp.ne.s32.totalorder %s1470_s16, %s1292_s22  ;;  %p1298_p13 = scmp.lt.s32.totalorder %s1292_s22, %s1292_s22 }
  0x1e   :  { %p1299_p0 = por %p1298_p13, %p1297_p12 }
  0x20   :  { %p1300_p1 = pnand %p1299_p0, %p1293_p11 }
  0x22   :  { %1303 = shalt.err (!%p1300_p1)
}
  0x23   :  { %44 = dma.hbm_to_vmem [thread:$0]  %s1683_s5, 2048, %s1470_s16, [#allocation3], %s1380_s25, %s1380_s25, %s1381_s26  }
  0x24   :  { %s1382_s23 = smov [#allocation7]   ;;  %s1383_s27 = smov [#allocation8]  }
  0x25   :  { %s66_s24 = sshll.u32 %s1382_s23, 4  ;;  %s82_s28 = sshll.u32 %s1383_s27, 4  ;;  %s67_s24 = int_to_ptr.vmem [resolvable:$true] %s66_s24  ;;  %s1507_s28 = int_to_ptr.vmem [resolvable:$true] %s82_s28 }
  0x26   :  { %s1304_s17 = scalar_lea.hbm %s1687_s9, 4096 }
  0x27   :  { %p1305_p2 = scmp.ne.s32.totalorder %s1687_s9, %s1304_s17  ;;  %p1308_p3 = scmp.lt.u32.totalorder %s1304_s17, %s1687_s9 }
  0x29   :  { %p1310_p4 = pnand %p1308_p3, %p1305_p2 }
  0x2b   :  { %1313 = shalt.err (!%p1310_p4)
}
  0x2c   :  { %s1314_s5 = scalar_lea.vmem %s67_s24, 4096  ;;  %p1319_p6 = scmp.lt.s32.totalorder %s67_s24, %s67_s24 }
  0x2d   :  { %p1315_p5 = scmp.ne.s32.totalorder %s67_s24, %s1314_s5  ;;  %p1320_p7 = scmp.lt.s32.totalorder %s1314_s5, %s1314_s5 }
  0x2f   :  { %p1321_p8 = por %p1320_p7, %p1319_p6 }
  0x31   :  { %p1322_p9 = pnand %p1321_p8, %p1315_p5 }
  0x33   :  { %1325 = shalt.err (!%p1322_p9)
}
  0x34   :  { %72 = dma.hbm_to_vmem [thread:$0]  %s1687_s9, 4096, %s67_s24, [#allocation6], %s1380_s25, %s1380_s25, %s1381_s26  }
  0x35   :  { %s1326_s23 = scalar_lea.hbm %s1690_s12, 2048 }
  0x36   :  { %p1327_p10 = scmp.ne.s32.totalorder %s1690_s12, %s1326_s23  ;;  %p1330_p11 = scmp.lt.u32.totalorder %s1326_s23, %s1690_s12 }
  0x38   :  { %p1332_p12 = pnand %p1330_p11, %p1327_p10 }
  0x3a   :  { %1335 = shalt.err (!%p1332_p12)
}
  0x3b   :  { %s1336_s18 = scalar_lea.vmem %s1507_s28, 2048  ;;  %p1341_p0 = scmp.lt.s32.totalorder %s1507_s28, %s1507_s28 }
  0x3c   :  { %p1337_p13 = scmp.ne.s32.totalorder %s1507_s28, %s1336_s18  ;;  %p1342_p1 = scmp.lt.s32.totalorder %s1336_s18, %s1336_s18 }
  0x3e   :  { %p1343_p2 = por %p1342_p1, %p1341_p0 }
  0x40   :  { %p1344_p3 = pnand %p1343_p2, %p1337_p13 }
  0x42   :  { %1347 = shalt.err (!%p1344_p3)
}
  0x43   :  { %88 = dma.hbm_to_vmem [thread:$0]  %s1690_s12, 2048, %s1507_s28, [#allocation9], %s1380_s25, %s1380_s25, %s1381_s26  }
  0x44   :  { %1370 = dma.done.wait [#allocation3], 2048  }
  0x45   :  { %1371 = vsyncadd [#allocation3], 4294965248 }
  0x46   :  { %1372 = dma.done.wait [#allocation6], 4608  }
  0x47   :  { %1373 = vsyncadd [#allocation6], 4294962688 }
  0x48   :  { %1374 = dma.done.wait [#allocation9], 2048  }
  0x49   :  { %1375 = vsyncadd [#allocation9], 4294965248  ;;  %v1384_v0 = vmov 0   ;;  %v103_v1 = vld [vmem:[%s1678_s0] sm:$0xff]  ;;  %v222_v3 = vld [vmem:[%s1681_s3 + $0x8] sm:$0xff]  ;;  %v1385_v5 = vmov 0.0|0.0  }
  0x4a   :  { %1243 = vset.pattern.permute.xlu0 %v1384_v0  ;;  %v221_v2 = vld [vmem:[%s1681_s3] sm:$0xff]  ;;  %v223_v4 = vld [vmem:[%s1681_s3 + $0x10] sm:$0xff]  ;;  %1112 = vmatprep.subr.bf16.mxu0 %v1385_v5  ;;  %v224_v7 = vld [vmem:[%s1681_s3 + $0x18] sm:$0xff]  ;;  %vm1386_vm0 = vmmov 0   ;;  %v1387_v8 = vmov 0.0   ;;  %vm232_vm13 = vcmask 261120  }
  0x4b   :  { %107 = vperm.xlu0 %1243, %v103_v1   ;;  %v1113_v6 = vpack.c.bf16 %v222_v3, %v221_v2  ;;  %958 = vmatprep.mubr.msk.f32.mxu0 %vm1386_vm0, %v1387_v8  ;;  %v1116_v9 = vpack.c.bf16 %v224_v7, %v223_v4  ;;  %v323_v10 = vld [vmem:[#allocation5] sm:$0xff]  ;;  %v324_v11 = vld [vmem:[#allocation5 + $0x8] sm:$0xff]  ;;  %v325_v12 = vld [vmem:[#allocation5 + $0x10] sm:$0xff]  ;;  %v1388_v29 = vmov 683565275  }
  0x4c   :  { %1118 = vmatprep.subr.bf16.mxu1 %v1385_v5  ;;  %969 = vmatprep.mubr.msk.f32.mxu1 %vm1386_vm0, %v1387_v8  ;;  %v1119_v13 = vpack.c.bf16 %v324_v11, %v323_v10  ;;  %v326_v14 = vld [vmem:[#allocation5 + $0x18] sm:$0xff]  ;;  %v855_v16 = vld [vmem:[%s1680_s2] ss:$0 sm:$0xff]  ;;  %v1389_v31 = vmov 2475754826  }
  0x4d   :  { %1114 = vmatpush3.bf16.msra.mxu0 %v1113_v6  ;;  %v1122_v15 = vpack.c.bf16 %v326_v14, %v325_v12  ;;  %v1390_v34 = vmov 2131351028   ;;  %v1391_v37 = vmov 2102212464   ;;  %v1392_v40 = vmov 920167782  }
  0x4e   :  { %1115 = vmatprep.subr.bf16.mxu0 %v1385_v5  ;;  %1120 = vmatpush3.bf16.msra.mxu1 %v1119_v13  ;;  %v1393_v43 = vmov 1326507024  }
  0x4f   :  { %1121 = vmatprep.subr.bf16.mxu1 %v1385_v5 }
  0x51   :  { %1117 = vmatpush3.bf16.msra.mxu0 %v1116_v9 }
  0x52   :  { %1148 = vmatprep.subr.bf16.mxu0 %v1385_v5  ;;  %1123 = vmatpush3.bf16.msra.mxu1 %v1122_v15 }
  0x53   :  { %1124 = vmatprep.subr.bf16.mxu1 %v1385_v5 }
  0xca   :  { %v108_v17 = vpop.permute.xlu0 %107 }
  0xcb   :  { %v1572_v18 = vmul.f32 %v855_v16, %v108_v17 }
  0xcd   :  { %v120_v19 = vand.u32 2139095040, %v1572_v18  ;;  %v117_v23 = vand.u32 2147483647, %v1572_v18  ;;  %vm119_vm8 = vcmp.lt.s32.totalorder %v1572_v18, 0  ;;  %vm209_vm14 = vweird.f32 %v1572_v18 }
  0xcf   :  { %v121_v20 = vshrl.u32 %v120_v19, 23  ;;  %v124_v26 = vand.u32 8388607, %v117_v23  ;;  %vm118_vm9 = vcmp.le.f32.partialorder %v117_v23, 0.7853982 }
  0xd1   :  { %v856_v21 = vadd.s32 4294967169, %v121_v20  ;;  %v125_v45 = vor.u32 8388608, %v124_v26 }
  0xd3   :  { %v127_v22 = vadd.s32 1, %v856_v21  ;;  %v165_v59 = vshll.u32 %v125_v45, 8 }
  0xd5   :  { %vm128_vm1 = vcmp.gt.s32.totalorder %v127_v22, 0 }
  0xd6   :  { %v129_v24 = vsel %vm128_vm1, %v127_v22, 0 }
  0xd7   :  { %v131_v25 = vand.u32 31, %v129_v24  ;;  %v130_v28 = vshrl.u32 %v129_v24, 5 }
  0xd9   :  { %v132_v27 = vsub.s32 32, %v131_v25  ;;  %v134_v30 = vshll.u32 %v1388_v29, %v131_v25  ;;  %v137_v32 = vshll.u32 %v1389_v31, %v131_v25  ;;  %v140_v36 = vshll.u32 %v1390_v34, %v131_v25 }
  0xda   :  { %v143_v39 = vshll.u32 %v1391_v37, %v131_v25  ;;  %v146_v42 = vshll.u32 %v1392_v40, %v131_v25  ;;  %vm149_vm2 = vcmp.lt.s32.totalorder %v130_v28, 1  ;;  %vm152_vm3 = vcmp.lt.s32.totalorder %v130_v28, 4 }
  0xdb   :  { %v135_v33 = vshrl.u32 %v1389_v31, %v132_v27  ;;  %v138_v35 = vshrl.u32 %v1390_v34, %v132_v27  ;;  %v141_v38 = vshrl.u32 %v1391_v37, %v132_v27  ;;  %v144_v41 = vshrl.u32 %v1392_v40, %v132_v27 }
  0xdc   :  { %v147_v44 = vshrl.u32 %v1393_v43, %v132_v27  ;;  %v133_v54 = vshrl.u32 %v1388_v29, %v132_v27  ;;  %vm151_vm4 = vcmp.lt.s32.totalorder %v130_v28, 3  ;;  %vm150_vm5 = vcmp.lt.s32.totalorder %v130_v28, 2 }
  0xdd   :  { %v136_v46 = vor.u32 %v135_v33, %v134_v30  ;;  %v139_v47 = vor.u32 %v138_v35, %v137_v32  ;;  %v142_v48 = vor.u32 %v141_v38, %v140_v36  ;;  %v145_v49 = vor.u32 %v144_v41, %v143_v39 }
  0xde   :  { %v148_v50 = vor.u32 %v147_v44, %v146_v42 }
  0xdf   :  { %v154_v51 = vsel %vm152_vm3, %v142_v48, 2102212464  ;;  %v157_v52 = vsel %vm149_vm2, %v136_v46, %v139_v47  ;;  %v161_v53 = vsel %vm149_vm2, %v139_v47, %v142_v48  ;;  %v158_v55 = vsel %vm152_vm3, %v145_v49, 920167782 }
  0xe0   :  { %v162_v56 = vsel %vm152_vm3, %v148_v50, 1326507024  ;;  %v159_v57 = vsel %vm151_vm4, %v142_v48, %v158_v55  ;;  %v153_v60 = vsel %vm149_vm2, %v133_v54, %v136_v46  ;;  %v155_v61 = vsel %vm151_vm4, %v139_v47, %v154_v51  ;;  %v308_v50 = vld [vmem:[#allocation2 + $0x8] sm:$0xff]  ;;  %v860_v51 = vld [vmem:[%s1682_s4] ss:$0 sm:$0xff] }
  0xe1   :  { %v163_v58 = vsel %vm151_vm4, %v145_v49, %v162_v56  ;;  %v160_v62 = vsel %vm150_vm5, %v157_v52, %v159_v57  ;;  %v156_v4 = vsel %vm150_vm5, %v153_v60, %v155_v61  ;;  %v307_v49 = vld [vmem:[#allocation2] sm:$0xff]  ;;  %v309_v56 = vld [vmem:[#allocation2 + $0x10] sm:$0xff]  ;;  %v310_v57 = vld [vmem:[#allocation2 + $0x18] sm:$0xff] }
  0xe2   :  { %v164_v63 = vsel %vm150_vm5, %v161_v53, %v163_v58  ;;  %v1581_v2 = vmul.u32.u64.low %v165_v59, %v160_v62  ;;  %v1582_v3 = vmul.u32.u64.high %v165_v59, %v160_v62, %v1581_v2  ;;  %v172_v7 = vmul.u32 %v165_v59, %v156_v4  ;;  %v311_v58 = vld [vmem:[#allocation2 + $0x20] sm:$0xff]  ;;  %v313_v61 = vld [vmem:[#allocation2 + $0x30] sm:$0xff]  ;;  %v314_v62 = vld [vmem:[#allocation2 + $0x38] sm:$0xff] }
  0xe3   :  { %v1578_v0 = vmul.u32.u64.low %v165_v59, %v164_v63  ;;  %v1579_v1 = vmul.u32.u64.high %v165_v59, %v164_v63, %v1578_v0  ;;  %v1125_v53 = vpack.c.bf16 %v308_v50, %v307_v49  ;;  %v312_v59 = vld [vmem:[#allocation2 + $0x28] sm:$0xff]  ;;  %v1134_v63 = vpack.c.bf16 %v314_v62, %v313_v61  ;;  %v318_v4 = vld [vmem:[#allocation2 + $0x58] sm:$0xff]  ;;  %v863_v50 = vld [vmem:[%s1685_s7] ss:$0 sm:$0xff] }
  0xe4   :  { %v175_v6 = vadd.s32 1, %v1582_v3  ;;  %v1131_v60 = vpack.c.bf16 %v312_v59, %v311_v58  ;;  %v315_v0 = vld [vmem:[#allocation2 + $0x40] sm:$0xff] }
  0xe5   :  { %vm174_vm6 = vc.u32 %v1579_v1, %v1581_v2  ;;  %v173_v21 = vadd.s32 %v1581_v2, %v1579_v1  ;;  %v316_v1 = vld [vmem:[#allocation2 + $0x48] sm:$0xff] }
  0xe6   :  { %v176_v9 = vsel %vm174_vm6, %v175_v6, %v1582_v3  ;;  %v1137_v2 = vpack.c.bf16 %v316_v1, %v315_v0  ;;  %v317_v3 = vld [vmem:[#allocation2 + $0x50] sm:$0xff]  ;;  %v623_v1 = vld [vmem:[#allocation7 + $0x80] sm:$0xff] }
  0xe7   :  { %v177_v10 = vadd.s32 %v176_v9, %v172_v7  ;;  %v1140_v6 = vpack.c.bf16 %v318_v4, %v317_v3  ;;  %v319_v7 = vld [vmem:[#allocation2 + $0x60] sm:$0xff]  ;;  %v320_v9 = vld [vmem:[#allocation2 + $0x68] sm:$0xff]  ;;  %v625_v4 = vld [vmem:[#allocation7 + $0x90] sm:$0xff] }
  0xe9   :  { %v178_v11 = vadd.s32 536870912, %v177_v10 }
  0xeb   :  { %v179_v12 = vshrl.u32 %v178_v11, 30  ;;  %v321_v11 = vld [vmem:[#allocation2 + $0x70] sm:$0xff] }
  0xed   :  { %v180_v13 = vshll.u32 %v179_v12, 30  ;;  %v203_v34 = vsub.s32 4, %v179_v12 }
  0xef   :  { %v181_v14 = vsub.s32 %v177_v10, %v180_v13  ;;  %v204_v37 = vsel %vm119_vm8, %v203_v34, %v179_v12  ;;  %v1143_v10 = vpack.c.bf16 %v320_v9, %v319_v7  ;;  %v322_v12 = vld [vmem:[#allocation2 + $0x78] sm:$0xff]  ;;  %v628_v9 = vld [vmem:[#allocation7 + $0xa8] sm:$0xff] }
  0xf0   :  { %v206_v39 = vsel %vm118_vm9, 0, %v204_v37  ;;  %v1146_v13 = vpack.c.bf16 %v322_v12, %v321_v11  ;;  %v629_v11 = vld [vmem:[#allocation7 + $0xb0] sm:$0xff]  ;;  %v630_v12 = vld [vmem:[#allocation7 + $0xb8] sm:$0xff] }
  0xf1   :  { %v183_v15 = vsub.s32 0, %v181_v14  ;;  %v210_v40 = vadd.s32 3, %v206_v39  ;;  %v514_v39 = vld [vmem:[#allocation7 + $0x58] sm:$0xff] }
  0xf3   :  { %v857_v16 = vmin.u32 %v183_v15, %v181_v14  ;;  %v211_v41 = vand.u32 3, %v210_v40 }
  0xf5   :  { %v185_v17 = vclz %v857_v16  ;;  %vm216_vm10 = vcmp.eq.s32.totalorder %v211_v41, 2  ;;  %vm213_vm11 = vcmp.eq.s32.totalorder %v211_v41, 0  ;;  %vm212_vm12 = vcmp.lt.s32.totalorder %v211_v41, 2  ;;  %v515_v41 = vld [vmem:[#allocation7 + $0x60] sm:$0xff] }
  0xf7   :  { %v858_v19 = vadd.s32 4294967294, %v185_v17 }
  0xf9   :  { %vm859_vm7 = vcmp.lt.s32.totalorder %v858_v19, 0 }
  0xfa   :  { %v188_v20 = vsel %vm859_vm7, 0, %v858_v19 }
  0xfb   :  { %v189_v22 = vsub.s32 32, %v188_v20  ;;  %v193_v24 = vsub.s32 4294967266, %v188_v20  ;;  %v190_v25 = vshll.u32 %v181_v14, %v188_v20  ;;  %v306_v14 = vld [vmem:[%s1679_s1] sm:$0xff] }
  0xfd   :  { %v191_v26 = vshrl.u32 %v173_v21, %v189_v22  ;;  %v194_v27 = vadd.s32 127, %v193_v24  ;;  %v503_v22 = vld [vmem:[#allocation7] sm:$0xff]  ;;  %v504_v24 = vld [vmem:[#allocation7 + $0x8] sm:$0xff] }
  0xff   :  { %v192_v28 = vor.u32 %v191_v26, %v190_v25  ;;  %v195_v29 = vshll.u32 %v194_v27, 23  ;;  %v1149_v25 = vpack.c.bf16 %v504_v24, %v503_v22  ;;  %v505_v26 = vld [vmem:[#allocation7 + $0x10] sm:$0xff]  ;;  %v506_v27 = vld [vmem:[#allocation7 + $0x18] sm:$0xff]  ;;  %v636_v22 = vld [vmem:[#allocation7 + $0xe8] sm:$0xff] }
 0x101   :  { %v196_v30 = vor.u32 4788187, %v195_v29  ;;  %v199_v32 = vcvt.s32.f32 %v192_v28  ;;  %v1152_v28 = vpack.c.bf16 %v506_v27, %v505_v26  ;;  %v507_v29 = vld [vmem:[#allocation7 + $0x20] sm:$0xff]  ;;  %v638_v26 = vld [vmem:[#allocation7 + $0xf8] sm:$0xff] }
 0x103   :  { %v197_v31 = vand.u32 2147483647, %v196_v30  ;;  %v508_v30 = vld [vmem:[#allocation7 + $0x28] sm:$0xff] }
 0x105   :  { %v200_v33 = vmul.f32 %v199_v32, %v197_v31  ;;  %v1155_v31 = vpack.c.bf16 %v508_v30, %v507_v29  ;;  %v509_v32 = vld [vmem:[#allocation7 + $0x30] sm:$0xff] }
 0x107   :  { %v201_v35 = vxor.u32 2147483648, %v200_v33 }
 0x109   :  { %v202_v36 = vsel %vm119_vm8, %v201_v35, %v200_v33  ;;  %v510_v33 = vld [vmem:[#allocation7 + $0x38] sm:$0xff]  ;;  %v511_v35 = vld [vmem:[#allocation7 + $0x40] sm:$0xff] }
 0x10a   :  { %v205_v38 = vsel %vm118_vm9, %v1572_v18, %v202_v36  ;;  %v1128_v18 = vpack.c.bf16 %v310_v57, %v309_v56  ;;  %v1158_v34 = vpack.c.bf16 %v510_v33, %v509_v32  ;;  %v512_v36 = vld [vmem:[#allocation7 + $0x48] sm:$0xff]  ;;  %v865_v32 = vld [vmem:[%s1688_s10] ss:$0 sm:$0xff] }
 0x10b   :  { %1244 = vcosq.f32 %v205_v38  ;;  %v1161_v37 = vpack.c.bf16 %v512_v36, %v511_v35 }
 0x10c   :  { %1246 = vsinq.f32 %v205_v38  ;;  %v513_v38 = vld [vmem:[#allocation7 + $0x50] sm:$0xff] }
 0x10d   :  { %v1164_v40 = vpack.c.bf16 %v514_v39, %v513_v38 }
 0x115   :  { %v1245_v42 = vpop.eup %1244 }
 0x116   :  { %v1247_v43 = vpop.eup %1246  ;;  %v217_v44 = vxor.u32 2147483648, %v1245_v42 }
 0x117   :  { %v214_v45 = vxor.u32 2147483648, %v1247_v43 }
 0x118   :  { %v218_v46 = vsel %vm216_vm10, %v217_v44, %v1247_v43  ;;  %v517_v44 = vld [vmem:[#allocation7 + $0x70] sm:$0xff] }
 0x119   :  { %v215_v47 = vsel %vm213_vm11, %v1245_v42, %v214_v45  ;;  %v516_v42 = vld [vmem:[#allocation7 + $0x68] sm:$0xff]  ;;  %v518_v45 = vld [vmem:[#allocation7 + $0x78] sm:$0xff] }
 0x11a   :  { %v219_v23 = vsel %vm212_vm12, %v215_v47, %v218_v46  ;;  %v1167_v43 = vpack.c.bf16 %v516_v42, %v515_v41  ;;  %v1170_v46 = vpack.c.bf16 %v518_v45, %v517_v44 }
 0x11b   :  { %v220_v48 = vsel %vm209_vm14, nan, %v219_v23 }
 0x11c   :  { %959 = vmatmul.mubr.msk.f32.vlgmr.msra.gmra.mrb[0].mxu0 %vm232_vm13, %v220_v48 }
 0x11d   :  { %1039 = vmatprep.mubr.msk.f32.mxu0 %vm1386_vm0, %v1387_v8  ;;  %1150 = vmatpush3.bf16.msra.mxu0 %v1149_v25  ;;  %v637_v25 = vld [vmem:[#allocation7 + $0xf0] sm:$0xff] }
 0x11e   :  { %1151 = vmatprep.subr.bf16.mxu0 %v1385_v5  ;;  %v1194_v27 = vpack.c.bf16 %v638_v26, %v637_v25 }
 0x121   :  { %1153 = vmatpush3.bf16.msra.mxu0 %v1152_v28 }
 0x122   :  { %1154 = vmatprep.subr.bf16.mxu0 %v1385_v5 }
 0x125   :  { %1156 = vmatpush3.bf16.msra.mxu0 %v1155_v31 }
 0x126   :  { %1157 = vmatprep.subr.bf16.mxu0 %v1385_v5 }
 0x129   :  { %1159 = vmatpush3.bf16.msra.mxu0 %v1158_v34  ;;  %v866_v34 = vld [vmem:[%s1689_s11] ss:$0 sm:$0xff] }
 0x12a   :  { %1160 = vmatprep.subr.bf16.mxu0 %v1385_v5 }
 0x12d   :  { %1162 = vmatpush3.bf16.msra.mxu0 %v1161_v37 }
 0x12e   :  { %1163 = vmatprep.subr.bf16.mxu0 %v1385_v5 }
 0x131   :  { %1165 = vmatpush3.bf16.msra.mxu0 %v1164_v40 }
 0x132   :  { %1166 = vmatprep.subr.bf16.mxu0 %v1385_v5 }
 0x135   :  { %1168 = vmatpush3.bf16.msra.mxu0 %v1167_v43 }
 0x136   :  { %1169 = vmatprep.subr.bf16.mxu0 %v1385_v5 }
 0x139   :  { %1171 = vmatpush3.bf16.msra.mxu0 %v1170_v46 }
 0x13a   :  { %1172 = vmatprep.subr.bf16.mxu0 %v1385_v5 }
 0x1ef   :  { %v302_v52 = vpop.f32.mrb[0].mxu0 }
 0x1f0   :  { %v303_v54 = vadd.f32 %v860_v51, %v302_v52  ;;  %v960_v55 = vpop.f32.mrb[1].mxu0  ;;  %v864_v52 = vld [vmem:[%s1686_s8] ss:$0 sm:$0xff] }
 0x1f2   :  { %970 = vmatmul.mubr.msk.f32.vlgmr.msra.gmra.mrb[0].mxu1 %vm232_vm13, %v303_v54 }
 0x1f3   :  { %1126 = vmatpush3.bf16.msra.mxu1 %v1125_v53  ;;  %1004 = vmatprep.mubr.msk.f32.mxu1 %vm1386_vm0, %v1387_v8 }
 0x1f4   :  { %1127 = vmatprep.subr.bf16.mxu1 %v1385_v5 }
 0x1f7   :  { %1129 = vmatpush3.bf16.msra.mxu1 %v1128_v18 }
 0x1f8   :  { %1130 = vmatprep.subr.bf16.mxu1 %v1385_v5 }
 0x1fb   :  { %1132 = vmatpush3.bf16.msra.mxu1 %v1131_v60 }
 0x1fc   :  { %1133 = vmatprep.subr.bf16.mxu1 %v1385_v5 }
 0x1ff   :  { %1135 = vmatpush3.bf16.msra.mxu1 %v1134_v63 }
 0x200   :  { %1136 = vmatprep.subr.bf16.mxu1 %v1385_v5 }
 0x203   :  { %1138 = vmatpush3.bf16.msra.mxu1 %v1137_v2  ;;  %v624_v2 = vld [vmem:[#allocation7 + $0x88] sm:$0xff] }
 0x204   :  { %1139 = vmatprep.subr.bf16.mxu1 %v1385_v5  ;;  %v1173_v3 = vpack.c.bf16 %v624_v2, %v623_v1  ;;  %v756_v1 = vld [vmem:[#allocation8 + $0x60] sm:$0xff]  ;;  %v757_v2 = vld [vmem:[#allocation8 + $0x68] sm:$0xff] }
 0x207   :  { %1141 = vmatpush3.bf16.msra.mxu1 %v1140_v6  ;;  %v626_v6 = vld [vmem:[#allocation7 + $0x98] sm:$0xff] }
 0x208   :  { %1142 = vmatprep.subr.bf16.mxu1 %v1385_v5  ;;  %v1176_v7 = vpack.c.bf16 %v626_v6, %v625_v4  ;;  %v758_v4 = vld [vmem:[#allocation8 + $0x70] sm:$0xff]  ;;  %v759_v6 = vld [vmem:[#allocation8 + $0x78] sm:$0xff] }
 0x20b   :  { %1144 = vmatpush3.bf16.msra.mxu1 %v1143_v10 }
 0x20c   :  { %1145 = vmatprep.subr.bf16.mxu1 %v1385_v5 }
 0x20f   :  { %1147 = vmatpush3.bf16.msra.mxu1 %v1146_v13  ;;  %v1182_v13 = vpack.c.bf16 %v630_v12, %v629_v11  ;;  %v869_v12 = vld [vmem:[%s1688_s10 + $0x1] ss:$0 sm:$0xff]  ;;  %s1394_s10 = smov [#allocation10]  }
 0x210   :  { %1196 = vmatprep.subr.bf16.mxu1 %v1385_v5  ;;  %s844_s5 = sshll.u32 %s1394_s10, 4  ;;  %s845_s5 = int_to_ptr.vmem [resolvable:$true] %s844_s5 }
 0x211   :  { %p1353_p5 = scmp.lt.s32.totalorder %s845_s5, %s845_s5 }
 0x212   :  { %1005 = vmatmul.mubr.f32.vlgmr.msra.gmra.mrb[0].mxu1 %v306_v14  ;;  %v631_v14 = vld [vmem:[#allocation7 + $0xc0] sm:$0xff] }
 0x213   :  { %1109 = vmatprep.mubr.msk.f32.mxu1 %vm1386_vm0, %v1387_v8 }
 0x2e5   :  { %v466_v15 = vpop.f32.mrb[0].mxu1 }
 0x2e6   :  { %472 = vadd.xlane.f32.xlu0 %v466_v15  ;;  %v1006_v16 = vpop.f32.mrb[1].mxu1 }
 0x373   :  { %v473_v17 = vpop.xlane.xlu0 %472 }
 0x374   :  { %v475_v19 = vmul.f32 0.0078125, %v473_v17  ;;  %v633_v17 = vld [vmem:[#allocation7 + $0xd0] sm:$0xff] }
 0x376   :  { %v476_v20 = vsub.f32 %v466_v15, %v475_v19  ;;  %v632_v15 = vld [vmem:[#allocation7 + $0xc8] sm:$0xff]  ;;  %v634_v19 = vld [vmem:[#allocation7 + $0xd8] sm:$0xff] }
 0x377   :  { %v1185_v16 = vpack.c.bf16 %v632_v15, %v631_v14  ;;  %v870_v14 = vld [vmem:[%s1689_s11 + $0x1] ss:$0 sm:$0xff]  ;;  %s1348_s11 = scalar_lea.vmem %s845_s5, 128 }
 0x378   :  { %v477_v21 = vmul.f32 %v476_v20, %v476_v20  ;;  %p1349_p4 = scmp.ne.s32.totalorder %s845_s5, %s1348_s11  ;;  %p1354_p6 = scmp.lt.s32.totalorder %s1348_s11, %s1348_s11 }
 0x37a   :  { %478 = vadd.xlane.f32.xlu1 %v477_v21  ;;  %v635_v21 = vld [vmem:[#allocation7 + $0xe0] sm:$0xff]  ;;  %p1355_p7 = por %p1354_p6, %p1353_p5 }
 0x37b   :  { %v1191_v24 = vpack.c.bf16 %v636_v22, %v635_v21 }
 0x37c   :  { %p1356_p8 = pnand %p1355_p7, %p1349_p4 }
 0x407   :  { %v479_v47 = vpop.xlane.xlu1 %478 }
 0x408   :  { %v480_v23 = vmul.f32 0.0078125, %v479_v47 }
 0x40a   :  { %v481_v48 = vadd.f32 1e-05, %v480_v23 }
 0x40c   :  { %1248 = vrsqrt.f32 %v481_v48  ;;  %v744_v48 = vld [vmem:[#allocation8] sm:$0xff] }
 0x416   :  { %v1249_v49 = vpop.eup %1248 }
 0x417   :  { %v483_v51 = vmul.f32 %v1249_v49, %v476_v20  ;;  %v1188_v20 = vpack.c.bf16 %v634_v19, %v633_v17  ;;  %v745_v49 = vld [vmem:[#allocation8 + $0x8] sm:$0xff] }
 0x419   :  { %v490_v53 = vmul.f32 %v863_v50, %v483_v51  ;;  %v1197_v50 = vpack.c.bf16 %v745_v49, %v744_v48  ;;  %v746_v51 = vld [vmem:[#allocation8 + $0x10] sm:$0xff] }
 0x41b   :  { %v497_v54 = vadd.f32 %v864_v52, %v490_v53  ;;  %1198 = vmatpush3.bf16.msra.mxu1 %v1197_v50  ;;  %v747_v52 = vld [vmem:[#allocation8 + $0x18] sm:$0xff] }
 0x41c   :  { %1199 = vmatprep.subr.bf16.mxu1 %v1385_v5  ;;  %v1200_v53 = vpack.c.bf16 %v747_v52, %v746_v51 }
 0x41d   :  { %v499_v55 = vmul.f32 0.70710677, %v497_v54  ;;  %v498_v57 = vmul.f32 0.5, %v497_v54  ;;  %v748_v54 = vld [vmem:[#allocation8 + $0x20] sm:$0xff] }
 0x41f   :  { %1250 = verf.f32 %v499_v55  ;;  %1201 = vmatpush3.bf16.msra.mxu1 %v1200_v53  ;;  %v749_v55 = vld [vmem:[#allocation8 + $0x28] sm:$0xff] }
 0x420   :  { %1202 = vmatprep.subr.bf16.mxu1 %v1385_v5 }
 0x429   :  { %v1251_v56 = vpop.eup %1250 }
 0x42a   :  { %v501_v18 = vadd.f32 1.0, %v1251_v56  ;;  %v1203_v56 = vpack.c.bf16 %v749_v55, %v748_v54 }
 0x42c   :  { %v1627_v58 = vmul.f32 %v501_v18, %v498_v57  ;;  %1204 = vmatpush3.bf16.msra.mxu1 %v1203_v56  ;;  %v750_v57 = vld [vmem:[#allocation8 + $0x30] sm:$0xff]  ;;  %v751_v18 = vld [vmem:[#allocation8 + $0x38] sm:$0xff] }
 0x42d   :  { %1205 = vmatprep.subr.bf16.mxu1 %v1385_v5 }
 0x42e   :  { %1040 = vmatmul.mubr.f32.vlgmr.msra.gmra.mrb[2].mxu0 %v1627_v58 }
 0x42f   :  { %1074 = vmatprep.mubr.msk.f32.mxu0 %vm1386_vm0, %v1387_v8  ;;  %1174 = vmatpush3.bf16.msra.mxu0 %v1173_v3  ;;  %v627_v8 = vld [vmem:[#allocation7 + $0xa0] sm:$0xff]  ;;  %v1215_v3 = vpack.c.bf16 %v757_v2, %v756_v1 }
 0x430   :  { %1175 = vmatprep.subr.bf16.mxu0 %v1385_v5  ;;  %v1179_v10 = vpack.c.bf16 %v628_v9, %v627_v8 }
 0x433   :  { %1177 = vmatpush3.bf16.msra.mxu0 %v1176_v7  ;;  %v1218_v7 = vpack.c.bf16 %v759_v6, %v758_v4 }
 0x434   :  { %1178 = vmatprep.subr.bf16.mxu0 %v1385_v5 }
 0x437   :  { %1180 = vmatpush3.bf16.msra.mxu0 %v1179_v10 }
 0x438   :  { %1181 = vmatprep.subr.bf16.mxu0 %v1385_v5 }
 0x43b   :  { %1183 = vmatpush3.bf16.msra.mxu0 %v1182_v13 }
 0x43c   :  { %1184 = vmatprep.subr.bf16.mxu0 %v1385_v5 }
 0x43f   :  { %1186 = vmatpush3.bf16.msra.mxu0 %v1185_v16 }
 0x440   :  { %1187 = vmatprep.subr.bf16.mxu0 %v1385_v5 }
 0x443   :  { %1189 = vmatpush3.bf16.msra.mxu0 %v1188_v20 }
 0x444   :  { %1190 = vmatprep.subr.bf16.mxu0 %v1385_v5 }
 0x447   :  { %1192 = vmatpush3.bf16.msra.mxu0 %v1191_v24  ;;  %v871_v24 = vld [vmem:[%s1691_s13] ss:$0 sm:$0xff] }
 0x448   :  { %1193 = vmatprep.subr.bf16.mxu0 %v1385_v5 }
 0x44b   :  { %1195 = vmatpush3.bf16.msra.mxu0 %v1194_v27 }
 0x501   :  { %v585_v59 = vpop.f32.mrb[2].mxu0 }
 0x502   :  { %591 = vadd.xlane.f32.xlu1 %v585_v59  ;;  %v1041_v60 = vpop.f32.mrb[3].mxu0 }
 0x503   :  { %v753_v60 = vld [vmem:[#allocation8 + $0x48] sm:$0xff] }
 0x58f   :  { %v592_v61 = vpop.xlane.xlu1 %591 }
 0x590   :  { %v593_v62 = vmul.f32 0.0078125, %v592_v61 }
 0x592   :  { %v594_v63 = vsub.f32 %v585_v59, %v593_v62  ;;  %v752_v59 = vld [vmem:[#allocation8 + $0x40] sm:$0xff]  ;;  %v754_v62 = vld [vmem:[#allocation8 + $0x50] sm:$0xff] }
 0x593   :  { %v1209_v61 = vpack.c.bf16 %v753_v60, %v752_v59 }
 0x594   :  { %v595_v0 = vmul.f32 %v594_v63, %v594_v63 }
 0x596   :  { %596 = vadd.xlane.f32.xlu1 %v595_v0 }
 0x623   :  { %v597_v28 = vpop.xlane.xlu1 %596 }
 0x624   :  { %v598_v29 = vmul.f32 0.0078125, %v597_v28 }
 0x626   :  { %v599_v30 = vadd.f32 1e-05, %v598_v29 }
 0x628   :  { %1252 = vrsqrt.f32 %v599_v30 }
 0x632   :  { %v1253_v31 = vpop.eup %1252 }
 0x633   :  { %v601_v33 = vmul.f32 %v1253_v31, %v594_v63  ;;  %v755_v63 = vld [vmem:[#allocation8 + $0x58] sm:$0xff] }
 0x634   :  { %v1212_v0 = vpack.c.bf16 %v755_v63, %v754_v62 }
 0x635   :  { %v608_v35 = vmul.f32 %v865_v32, %v601_v33 }
 0x637   :  { %v615_v36 = vadd.f32 %v866_v34, %v608_v35 }
 0x639   :  { %v617_v37 = vmul.f32 0.70710677, %v615_v36  ;;  %v616_v39 = vmul.f32 0.5, %v615_v36 }
 0x63b   :  { %1254 = verf.f32 %v617_v37 }
 0x645   :  { %v1255_v38 = vpop.eup %1254 }
 0x646   :  { %v619_v40 = vadd.f32 1.0, %v1255_v38 }
 0x648   :  { %v620_v41 = vmul.f32 %v619_v40, %v616_v39 }
 0x64a   :  { %v1646_v42 = vadd.f32 %v620_v41, %v1627_v58  ;;  %v1206_v58 = vpack.c.bf16 %v751_v18, %v750_v57 }
 0x64c   :  { %1075 = vmatmul.mubr.f32.vlgmr.msra.gmra.mrb[4].mxu0 %v1646_v42  ;;  %1207 = vmatpush3.bf16.msra.mxu1 %v1206_v58 }
 0x64d   :  { %1208 = vmatprep.subr.bf16.mxu1 %v1385_v5 }
 0x650   :  { %1210 = vmatpush3.bf16.msra.mxu1 %v1209_v61 }
 0x651   :  { %1211 = vmatprep.subr.bf16.mxu1 %v1385_v5 }
 0x654   :  { %1213 = vmatpush3.bf16.msra.mxu1 %v1212_v0 }
 0x655   :  { %1214 = vmatprep.subr.bf16.mxu1 %v1385_v5 }
 0x658   :  { %1216 = vmatpush3.bf16.msra.mxu1 %v1215_v3 }
 0x659   :  { %1217 = vmatprep.subr.bf16.mxu1 %v1385_v5 }
 0x65c   :  { %1219 = vmatpush3.bf16.msra.mxu1 %v1218_v7 }
 0x71f   :  { %v705_v43 = vpop.f32.mrb[4].mxu0 }
 0x720   :  { %713 = vadd.xlane.f32.xlu1 %v705_v43  ;;  %v1076_v44 = vpop.f32.mrb[5].mxu0 }
 0x7ad   :  { %v714_v45 = vpop.xlane.xlu1 %713 }
 0x7ae   :  { %v715_v46 = vmul.f32 0.0078125, %v714_v45 }
 0x7b0   :  { %v716_v47 = vsub.f32 %v705_v43, %v715_v46 }
 0x7b2   :  { %v717_v23 = vmul.f32 %v716_v47, %v716_v47 }
 0x7b4   :  { %718 = vadd.xlane.f32.xlu1 %v717_v23 }
 0x841   :  { %v719_v8 = vpop.xlane.xlu1 %718 }
 0x842   :  { %v720_v9 = vmul.f32 0.0078125, %v719_v8 }
 0x844   :  { %v721_v10 = vadd.f32 1e-05, %v720_v9 }
 0x846   :  { %1256 = vrsqrt.f32 %v721_v10 }
 0x850   :  { %v1257_v11 = vpop.eup %1256 }
 0x851   :  { %v723_v13 = vmul.f32 %v1257_v11, %v716_v47 }
 0x853   :  { %v730_v15 = vmul.f32 %v869_v12, %v723_v13 }
 0x855   :  { %v737_v16 = vadd.f32 %v870_v14, %v730_v15 }
 0x857   :  { %v739_v17 = vmul.f32 0.70710677, %v737_v16  ;;  %v738_v19 = vmul.f32 0.5, %v737_v16 }
 0x859   :  { %1258 = verf.f32 %v739_v17 }
 0x863   :  { %v1259_v5 = vpop.eup %1258 }
 0x864   :  { %v741_v20 = vadd.f32 1.0, %v1259_v5 }
 0x866   :  { %v742_v21 = vmul.f32 %v741_v20, %v738_v19 }
 0x868   :  { %v743_v22 = vadd.f32 %v742_v21, %v1646_v42 }
 0x86a   :  { %1110 = vmatmul.mubr.f32.vlgmr.msra.gmra.mrb[2].mxu1 %v743_v22 }
 0x93d   :  { %v833_v25 = vpop.f32.mrb[2].mxu1 }
 0x93e   :  { %v834_v26 = vadd.f32 %v871_v24, %v833_v25  ;;  %v1111_v27 = vpop.f32.mrb[3].mxu1 }
 0x940   :  { %837 = vst [vmem:[#allocation10] sm:$0xff] %v834_v26 }
 0x941   :  { %1359 = shalt.err (!%p1356_p8)
}
 0x942   :  { %s1360_s12 = scalar_lea.hbm %s1692_s14, 128 }
 0x943   :  { %p1361_p9 = scmp.ne.s32.totalorder %s1692_s14, %s1360_s12  ;;  %p1364_p10 = scmp.lt.u32.totalorder %s1360_s12, %s1692_s14 }
 0x945   :  { %p1366_p11 = pnand %p1364_p10, %p1361_p9 }
 0x947   :  { %1369 = shalt.err (!%p1366_p11)
}
 0x948   :  { %847 = dma.vmem_to_hbm [thread:$0]  %s845_s5, 128, %s1692_s14, [#allocation4]  }
 0x949   :  { %1376 = dma.done.wait [#allocation4], 128  }
 0x94a   :  { %1377 = vsyncadd [#allocation4], 4294967168 }
 0x94b   :  { %851 = vsyncpa [#allocation3], 1 }
 0x94c   :  { %852 = vsyncpa [#allocation6], 1 }
 0x94d   :  { %853 = vsyncpa [#allocation9], 1 }
 0x94e   :  { %854 = vsyncpa [#allocation4], 1 }

</bundles_post_ra>
